<compile_context>
chip_gen: v5e
topology: v5e:2x2
jax: 0.10.0
libtpu: 0.0.40
codegen_flags: <defaults>
</compile_context>

<pallas_src>
import functools

import jax
import jax.numpy as jnp
from jax.experimental import pallas as pl
from jax.experimental.pallas import tpu as pltpu

_LANES = 128
_TILE_BYTES = 2 * 1024 * 1024   # per-input VMEM tile budget (x2 inputs x2 bufs = 8 MiB)
_CHUNK_ROWS = 64                # rows per in-kernel fori_loop chunk


def _rmse_kernel(p_ref, t_ref, o_ref, acc_ref, *,
                 n_rows: int, row_tile: int, chunk: int,
                 tiles_per_split: int, any_partial: bool):
    c = pl.program_id(0)   # split index (parallel across TensorCores where available)
    k = pl.program_id(1)   # sequential reduction axis within the split

    @pl.when(k == 0)
    def _():
        acc_ref[...] = jnp.zeros_like(acc_ref)

    tile_idx = c * tiles_per_split + k          # un-clamped logical tile index
    row_start = tile_idx * row_tile
    n_chunks = row_tile // chunk                # static

    def accumulate(masked: bool):
        # Chunked accumulation: each step loads a (chunk, 128) slice from each
        # input, squares the difference and folds it into a single (8, 128)
        # vreg-resident partial sum carried through the loop.  Live state stays
        # within a handful of vregs (no large materialized intermediates).
        def body(i, acc):
            off = pl.multiple_of(i * chunk, chunk)
            d = (p_ref[pl.ds(off, chunk), :].astype(jnp.float32)
                 - t_ref[pl.ds(off, chunk), :].astype(jnp.float32))
            d2 = d * d
            if masked:
                rid = (row_start + off
                       + jax.lax.broadcasted_iota(jnp.int32, (chunk, _LANES), 0))
                d2 = jnp.where(rid < n_rows, d2, 0.0)
            return acc + d2.reshape(chunk // 8, 8, _LANES).sum(axis=0)

        part = jax.lax.fori_loop(
            0, n_chunks, body, jnp.zeros((8, _LANES), jnp.float32),
            unroll=min(n_chunks, 8))
        acc_ref[...] += part

    if any_partial:
        # Predicated masking: only the partial last tile (and the at-most-one
        # clamped duplicate tile) pays for iota/compare/select.
        needs_mask = row_start + row_tile > n_rows

        @pl.when(needs_mask)
        def _():
            accumulate(True)

        @pl.when(jnp.logical_not(needs_mask))
        def _():
            accumulate(False)
    else:
        accumulate(False)

    @pl.when(k == pl.num_programs(1) - 1)
    def _():
        # Single cross-lane/sublane reduce per split; scalar partial sum out.
        o_ref[0, 0] = jnp.sum(acc_ref[...])


def _round_down(x: int, m: int) -> int:
    return (x // m) * m


def _sublane_multiple(*dtypes) -> int:
    # Min second-minor multiple: 8 for 4-byte, 16 for 2-byte, 32 for 1-byte.
    return max(max(8, 32 // jnp.dtype(d).itemsize) for d in dtypes)


def rmse_loss(preds: jax.Array, target: jax.Array) -> jax.Array:
    """Returns a scalar f32: sqrt(mean((preds - target)^2))."""
    assert preds.shape == target.shape, (preds.shape, target.shape)
    total_n = preds.size
    if total_n == 0:
        # torch.sqrt(nn.MSELoss()(empty, empty)) is NaN.
        return jnp.float32(float("nan"))

    # Flatten in native dtype (layout-preserving; in-kernel cast to f32).
    p = preds.reshape(-1)
    t = target.reshape(-1)

    main_rows = total_n // _LANES
    tail_n = total_n - main_rows * _LANES

    # Sizes not divisible by 128: the <128-element tail is folded in with
    # plain JAX (negligible) instead of padding/copying the whole array.
    if tail_n:
        dtail = (p[main_rows * _LANES:].astype(jnp.float32)
                 - t[main_rows * _LANES:].astype(jnp.float32))
        tail_ss = jnp.sum(dtail * dtail)
    else:
        tail_ss = jnp.float32(0.0)

    if main_rows == 0:
        return jnp.sqrt(tail_ss / jnp.float32(total_n))

    if tail_n:
        # Ragged total size: kernel consumes the 128-aligned prefix only.
        p_main = p[: main_rows * _LANES]
        t_main = t[: main_rows * _LANES]
    else:
        p_main, t_main = p, t          # zero-copy path (common case)

    p2 = p_main.reshape(main_rows, _LANES)
    t2 = t_main.reshape(main_rows, _LANES)

    mult = _sublane_multiple(preds.dtype, target.dtype)   # 8 / 16 / 32
    rows = main_rows
    if rows < mult:
        # Tiny input (< mult*128 elements): pad a handful of zero rows so the
        # single block is sublane-aligned.  Zero rows contribute 0 to the sum.
        p2 = jnp.pad(p2, ((0, mult - rows), (0, 0)))
        t2 = jnp.pad(t2, ((0, mult - rows), (0, 0)))
        rows = mult

    max_item = max(jnp.dtype(preds.dtype).itemsize,
                   jnp.dtype(target.dtype).itemsize)
    budget_rows = max(mult, _round_down(_TILE_BYTES // (_LANES * max_item), mult))
    row_tile = min(budget_rows, _round_down(rows, mult))
    chunk = _CHUNK_ROWS if row_tile % _CHUNK_ROWS == 0 else mult

    n_tiles = pl.cdiv(rows, row_tile)
    # Gate the split: no duplicate DMA / wasted step when there is one tile.
    num_splits = 2 if n_tiles >= 2 else 1
    tiles_per_split = pl.cdiv(n_tiles, num_splits)
    needs_clamp = num_splits * tiles_per_split > n_tiles
    any_partial = (rows % row_tile != 0) or needs_clamp

    def in_map(c, k):
        idx = c * tiles_per_split + k
        if needs_clamp:
            # The single over-hanging step reuses the previous block index, so
            # Pallas elides its DMA; its contribution is masked to 0 in-kernel.
            idx = jnp.minimum(idx, n_tiles - 1)
        return (idx, 0)

    partials = pl.pallas_call(
        functools.partial(_rmse_kernel, n_rows=rows, row_tile=row_tile,
                          chunk=chunk, tiles_per_split=tiles_per_split,
                          any_partial=any_partial),
        out_shape=jax.ShapeDtypeStruct((num_splits, 1), jnp.float32),
        grid_spec=pltpu.PrefetchScalarGridSpec(
            num_scalar_prefetch=0,
            grid=(num_splits, tiles_per_split),
            in_specs=[
                pl.BlockSpec((row_tile, _LANES), in_map),
                pl.BlockSpec((row_tile, _LANES), in_map),
            ],
            out_specs=pl.BlockSpec((1, 1), lambda c, k: (c, 0),
                                   memory_space=pltpu.MemorySpace.SMEM),
            scratch_shapes=[pltpu.VMEM((8, _LANES), jnp.float32)],
        ),
        compiler_params=pltpu.CompilerParams(
            dimension_semantics=("parallel", "arbitrary"),
        ),
    )(p2, t2)

    return jnp.sqrt((jnp.sum(partials) + tail_ss) / jnp.float32(total_n))


if __name__ == "__main__":
    key = jax.random.PRNGKey(0)
    kp, kt = jax.random.split(key)
    # Small NCHW-like shapes consistent with a regression head's outputs.
    shape = (2, 4, 16, 16)
    preds = jax.random.normal(kp, shape, dtype=jnp.float32)
    target = jax.random.normal(kt, shape, dtype=jnp.float32)

    loss = jax.block_until_ready(rmse_loss(preds, target))

    # Reference check in plain JAX.
    ref = jnp.sqrt(jnp.mean((preds - target) ** 2))
    assert jnp.allclose(loss, ref, rtol=1e-5, atol=1e-6), (loss, ref)
    print("KERNEL_OK")
</pallas_src>

<mosaic_0001>
module attributes {stable_mosaic.version = 11 : i64} {
  func.func @_rmse_kernel(%arg0: i32, %arg1: i32, %arg2: memref<16x128xf32, #tpu.memory_space<vmem>>, %arg3: memref<16x128xf32, #tpu.memory_space<vmem>>, %arg4: memref<1x1xf32, #tpu.memory_space<smem>>, %arg5: memref<8x128xf32, #tpu.memory_space<vmem>>) attributes {dimension_semantics = [#tpu.dimension_semantics<parallel>, #tpu.dimension_semantics<arbitrary>], iteration_bounds = array<i64: 1, 1>, scalar_prefetch = 0 : i64, scratch_operands = 1 : i64, tpu.core_type = #tpu.core_type<tc>, window_params = [{transform_indices = @transform_0, window_bounds = array<i64: 16, 128>}, {transform_indices = @transform_1, window_bounds = array<i64: 16, 128>}, {transform_indices = @transform_2, window_bounds = array<i64: 1, 1>}]} {
    %c0_i32 = arith.constant 0 : i32
    %0 = arith.cmpi eq, %arg1, %c0_i32 : i32
    %1 = arith.extui %0 : i1 to i32
    %c0_i32_0 = arith.constant 0 : i32
    %2 = arith.cmpi ne, %1, %c0_i32_0 : i32
    scf.if %2 {
      %cst_14 = arith.constant 0.000000e+00 : f32
      %32 = vector.broadcast %cst_14 : f32 to vector<8x128xf32>
      %c0_15 = arith.constant 0 : index
      %c0_16 = arith.constant 0 : index
      %33 = vector.load %arg5[%c0_15, %c0_16] : memref<8x128xf32, #tpu.memory_space<vmem>>, vector<8x128xf32>
      tpu.vector_store %arg5[%c0_15, %c0_16], %32 {strides = array<i32>} : memref<8x128xf32, #tpu.memory_space<vmem>>, vector<8x128xf32>,
    } else {
    }
    %cst = arith.constant 0.000000e+00 : f32
    %3 = vector.broadcast %cst : f32 to vector<8x128xf32>
    %c0_i32_1 = arith.constant 0 : i32
    %c8_i32 = arith.constant 8 : i32
    %4 = arith.muli %c0_i32_1, %c8_i32 : i32
    %5 = tpu.assume_multiple %4, 8 : i32
    %6 = arith.index_cast %5 : i32 to index
    %c0 = arith.constant 0 : index
    %7 = vector.load %arg2[%6, %c0] : memref<16x128xf32, #tpu.memory_space<vmem>>, vector<8x128xf32>
    %8 = arith.index_cast %5 : i32 to index
    %c0_2 = arith.constant 0 : index
    %9 = vector.load %arg3[%8, %c0_2] : memref<16x128xf32, #tpu.memory_space<vmem>>, vector<8x128xf32>
    %10 = arith.subf %7, %9 : vector<8x128xf32>
    %11 = arith.mulf %10, %10 : vector<8x128xf32>
    %12 = vector.shape_cast %11 : vector<8x128xf32> to vector<1x8x128xf32>
    %cst_3 = arith.constant dense<0.000000e+00> : vector<8x128xf32>
    %13 = vector.multi_reduction <add>, %12, %cst_3 [0] : vector<1x8x128xf32> to vector<8x128xf32>
    %14 = arith.addf %3, %13 : vector<8x128xf32>
    %c1_i32 = arith.constant 1 : i32
    %c8_i32_4 = arith.constant 8 : i32
    %15 = arith.muli %c1_i32, %c8_i32_4 : i32
    %16 = tpu.assume_multiple %15, 8 : i32
    %17 = arith.index_cast %16 : i32 to index
    %c0_5 = arith.constant 0 : index
    %18 = vector.load %arg2[%17, %c0_5] : memref<16x128xf32, #tpu.memory_space<vmem>>, vector<8x128xf32>
    %19 = arith.index_cast %16 : i32 to index
    %c0_6 = arith.constant 0 : index
    %20 = vector.load %arg3[%19, %c0_6] : memref<16x128xf32, #tpu.memory_space<vmem>>, vector<8x128xf32>
    %21 = arith.subf %18, %20 : vector<8x128xf32>
    %22 = arith.mulf %21, %21 : vector<8x128xf32>
    %23 = vector.shape_cast %22 : vector<8x128xf32> to vector<1x8x128xf32>
    %cst_7 = arith.constant dense<0.000000e+00> : vector<8x128xf32>
    %24 = vector.multi_reduction <add>, %23, %cst_7 [0] : vector<1x8x128xf32> to vector<8x128xf32>
    %25 = arith.addf %14, %24 : vector<8x128xf32>
    %c2_i32 = arith.constant 2 : i32
    %c0_8 = arith.constant 0 : index
    %c0_9 = arith.constant 0 : index
    %26 = vector.load %arg5[%c0_8, %c0_9] : memref<8x128xf32, #tpu.memory_space<vmem>>, vector<8x128xf32>
    %27 = arith.addf %26, %25 : vector<8x128xf32>
    %c0_10 = arith.constant 0 : index
    %c0_11 = arith.constant 0 : index
    %28 = vector.load %arg5[%c0_10, %c0_11] : memref<8x128xf32, #tpu.memory_space<vmem>>, vector<8x128xf32>
    tpu.vector_store %arg5[%c0_10, %c0_11], %27 {strides = array<i32>} : memref<8x128xf32, #tpu.memory_space<vmem>>, vector<8x128xf32>,
    %c0_i32_12 = arith.constant 0 : i32
    %29 = arith.cmpi eq, %arg1, %c0_i32_12 : i32
    %30 = arith.extui %29 : i1 to i32
    %c0_i32_13 = arith.constant 0 : i32
    %31 = arith.cmpi ne, %30, %c0_i32_13 : i32
    scf.if %31 {
      %c0_14 = arith.constant 0 : index
      %c0_15 = arith.constant 0 : index
      %32 = vector.load %arg5[%c0_14, %c0_15] : memref<8x128xf32, #tpu.memory_space<vmem>>, vector<8x128xf32>
      %33 = vector.shape_cast %32 : vector<8x128xf32> to vector<1x8x128xf32>
      %cst_16 = arith.constant dense<0.000000e+00> : vector<1xf32>
      %34 = vector.multi_reduction <add>, %33, %cst_16 [1, 2] : vector<1x8x128xf32> to vector<1xf32>
      %35 = vector.shape_cast %34 : vector<1xf32> to vector<1x1x1xf32>
      %36 = vector.extract %35[0, 0, 0] : f32 from vector<1x1x1xf32>
      %c0_17 = arith.constant 0 : index
      %c0_18 = arith.constant 0 : index
      %37 = memref.load %arg4[%c0_17, %c0_18] : memref<1x1xf32, #tpu.memory_space<smem>>
      memref.store %36, %arg4[%c0_17, %c0_18] : memref<1x1xf32, #tpu.memory_space<smem>>
    } else {
    }
    return
  }
  func.func @transform_0(%arg0: i32, %arg1: i32) -> (i32, i32) {
    %c1_i32 = arith.constant 1 : i32
    %0 = arith.muli %arg0, %c1_i32 : i32
    %1 = arith.addi %0, %arg1 : i32
    %c0_i32 = arith.constant 0 : i32
    %c0_i32_0 = arith.constant 0 : i32
    return %1, %c0_i32 : i32, i32
  }
  func.func @transform_1(%arg0: i32, %arg1: i32) -> (i32, i32) {
    %c1_i32 = arith.constant 1 : i32
    %0 = arith.muli %arg0, %c1_i32 : i32
    %1 = arith.addi %0, %arg1 : i32
    %c0_i32 = arith.constant 0 : i32
    %c0_i32_0 = arith.constant 0 : i32
    return %1, %c0_i32 : i32, i32
  }
  func.func @transform_2(%arg0: i32, %arg1: i32) -> (i32, i32) {
    %c0_i32 = arith.constant 0 : i32
    %c0_i32_0 = arith.constant 0 : i32
    return %arg0, %c0_i32 : i32, i32
  }
}

</mosaic_0001>

<bundles_post_ra>
// kernel: tpu_custom_call.1
= control target key start
LH: loop header
LB: loop body
LE: loop exit
PB: predicated region body
PF: predicated region fallthrough
CT: control target
= control target key end

     0   :  { %7 = vsyncpa [#allocation4], 0  ;;  %s212_s0 = inlined_call_operand.hbm [shape: f32[16,128], index: 0, kind: input, shape index: {}]   ;;  %s213_s1 = inlined_call_operand.hbm [shape: f32[16,128], index: 1, kind: input, shape index: {}]   ;;  %s214_s2 = inlined_call_operand.hbm [shape: f32[1,1], index: 2, kind: output, shape index: {}]  }
   0x1   :  { %8 = vsyncpa [#allocation7], 0 }
   0x2   :  { %9 = vsyncpa [#allocation5], 0  ;;  %s18_s11 = sshll.u32 %s212_s0, 4  ;;  %s183_s12 = smov [#allocation3]   ;;  %s19_s11 = int_to_ptr.hbm [resolvable:$true] %s18_s11 }
   0x3   :  { %s20_s13 = sshll.u32 %s183_s12, 4  ;;  %s35_s16 = sshll.u32 %s213_s1, 4  ;;  %s21_s13 = int_to_ptr.vmem [resolvable:$true] %s20_s13  ;;  %s36_s16 = int_to_ptr.hbm [resolvable:$true] %s35_s16 }
   0x4   :  { %s184_s17 = smov 128   ;;  %s185_s18 = smov 8  }
   0x5   :  { %26 = dma.hbm_to_vmem [thread:$0]  %s19_s11, 256, %s21_s13, [#allocation4], %s184_s17, %s184_s17, %s185_s18  }
   0x6   :  { %s186_s19 = smov [#allocation6]  }
   0x7   :  { %s37_s20 = sshll.u32 %s186_s19, 4  ;;  %s38_s20 = int_to_ptr.vmem [resolvable:$true] %s37_s20 }
   0x8   :  { %43 = dma.hbm_to_vmem [thread:$0]  %s36_s16, 256, %s38_s20, [#allocation7], %s184_s17, %s184_s17, %s185_s18  }
   0x9   :  { %177 = dma.done.wait [#allocation4], 256  }
   0xa   :  { %178 = vsyncadd [#allocation4], 4294967040 }
   0xb   :  { %179 = dma.done.wait [#allocation7], 256  }
   0xc   :  { %180 = vsyncadd [#allocation7], 4294967040  ;;  %v61_v0 = vld [vmem:[#allocation3] sm:$0xff]  ;;  %v62_v1 = vld [vmem:[#allocation6] sm:$0xff]  ;;  %s98_s21 = sshll.u32 %s214_s2, 4  ;;  %s187_s23 = smov [#allocation8]   ;;  %s99_s21 = int_to_ptr.hbm [resolvable:$true] %s98_s21 }
   0xd   :  { %v68_v2 = vld [vmem:[#allocation3 + $0x8] sm:$0xff]  ;;  %v63_v3 = vsub.f32 %v61_v0, %v62_v1  ;;  %v70_v4 = vld [vmem:[#allocation6 + $0x8] sm:$0xff] }
   0xe   :  { %v71_v5 = vsub.f32 %v68_v2, %v70_v4 }
   0xf   :  { %v64_v6 = vmul.f32 %v63_v3, %v63_v3 }
  0x10   :  { %v72_v7 = vmul.f32 %v71_v5, %v71_v5 }
  0x12   :  { %v74_v8 = vadd.f32 %v72_v7, %v64_v6 }
  0x14   :  { %82 = vadd.xlane.f32.xlu0 %v74_v8 }
  0x87   :  { %v83_v9 = vpop.xlane.xlu0 %82 }
  0x88   :  { %v84_v10 = vrot.slane %v83_v9, 4 }
  0x8a   :  { %v85_v11 = vadd.f32 %v84_v10, %v83_v9 }
  0x8c   :  { %v86_v12 = vrot.slane %v85_v11, 2 }
  0x8e   :  { %v87_v13 = vadd.f32 %v86_v12, %v85_v11 }
  0x90   :  { %v88_v14 = vrot.slane %v87_v13, 1 }
  0x92   :  { %v89_v15 = vadd.f32 %v88_v14, %v87_v13 }
  0x94   :  { %110 = vpush %v89_v15 }
  0xc5   :  { %s111_s22 = spop %110 }
  0xc6   :  { %92 = sst [smem:[#allocation8]] %s111_s22 }
  0xc7   :  { %101 = dma.smem_to_hbm %s187_s23, 16, %s99_s21, [#allocation5]  }
  0xc8   :  { %181 = dma.done.wait [#allocation5], 16  }
  0xc9   :  { %182 = vsyncadd [#allocation5], 4294967280 }
  0xca   :  { %106 = sfence }
  0xcb   :  { %107 = vsyncpa [#allocation4], 1 }
  0xcc   :  { %108 = vsyncpa [#allocation7], 1 }
  0xcd   :  { %109 = vsyncpa [#allocation5], 1 }

</bundles_post_ra>
